<compile_context>
chip_gen: v5e
topology: v5e:2x2
jax: 0.10.0
libtpu: 0.0.40
codegen_flags: <defaults>
</compile_context>

<pallas_src>
import jax
import jax.numpy as jnp
from jax.experimental import pallas as pl
from jax.experimental.pallas import tpu as pltpu

N = 32            # feature / channel dimension (module-level global `N` in the source)
B = 8             # demo batch size
EPS = 1e-5        # torch.nn.GroupNorm default eps (used only by the pure-JAX reference)
LANES = 128       # TPU lane width
PACK = LANES // N  # batch rows folded per lane row (4 for N=32); requires N | 128


def odefunc_kernel(y_ref, slab_ref, o_ref):
    lanes = slab_ref.shape[1]                       # PACK * N == 128

    y = y_ref[...]                                  # (tb, 128): 4 batch rows per row
    w1 = slab_ref[0:lanes, :]                       # (128, 128) = kron(I4, W1^T)
    w2 = slab_ref[lanes:2 * lanes, :]               # (128, 128) = kron(I4, W2^T)
    bt1 = slab_ref[2 * lanes:2 * lanes + 1, :]      # (1, 128)  beta1 tiled x4
    bt2 = slab_ref[2 * lanes + 1:2 * lanes + 2, :]  # (1, 128)  beta2 tiled x4

    # fcc1 on the MXU (block-diagonal weight => 4 independent y @ W1^T per row).
    # `+ b1` is omitted: it is multiplied by an exact 0.0 by the GroupNorm fold below.
    h = jnp.dot(y, w1, preferred_element_type=jnp.float32)
    # norm1: GroupNorm(N, N) on a 2-D input -> group size 1 -> xhat == 0 exactly, so the
    # output is beta1.  `h * 0.0` keeps the data dependency so NaN/Inf propagate as in
    # torch while dropping the sub/rsqrt/gamma work.
    h = h * 0.0 + bt1
    h = jnp.maximum(h, 0.0)                         # relu1
    # fcc2 + norm2 + relu2 (same constant fold)
    h = jnp.dot(h, w2, preferred_element_type=jnp.float32)
    h = h * 0.0 + bt2
    o_ref[...] = jnp.maximum(h, 0.0)


def pack_params(W1, bt1, W2, bt2):
    """Build the single (2*128 + 8, 128) parameter slab (one DMA, resident in VMEM)."""
    n = W1.shape[0]
    assert LANES % n == 0, "lane-packing assumes N divides 128"
    pack = LANES // n
    eye = jnp.eye(pack, dtype=jnp.float32)
    w1k = jnp.kron(eye, W1.T.astype(jnp.float32))            # (128, 128) block-diag
    w2k = jnp.kron(eye, W2.T.astype(jnp.float32))            # (128, 128) block-diag
    bt1t = jnp.tile(bt1.astype(jnp.float32), pack)[None, :]  # (1, 128)
    bt2t = jnp.tile(bt2.astype(jnp.float32), pack)[None, :]  # (1, 128)
    pad = jnp.zeros((6, LANES), jnp.float32)                 # pad params to 8 sublanes
    return jnp.concatenate([w1k, w2k, bt1t, bt2t, pad], axis=0)   # (264, 128)


def odefunc_forward(t, y, slab, *, tile_rows_cap=2048):
    """Pallas implementation of ODEFunc.forward(t, y).  `t` is unused (as in torch)."""
    del t
    batch, n = y.shape
    pack = slab.shape[1] // n                       # 4

    # Lane-pack: fold `pack` batch rows per 128-lane row (contiguous reshape; pad batch).
    pad_b = (-batch) % pack
    yp = jnp.pad(y.astype(jnp.float32), ((0, pad_b), (0, 0))) if pad_b else y.astype(jnp.float32)
    yp = yp.reshape(-1, pack * n)                   # (rows, 128)
    rows = yp.shape[0]

    # Biggest tile that fits comfortably; large batches get >=2 grid steps (v7x 2-TC
    # sharding via "parallel"), small batches run as a single full-extent block.
    tb = rows if rows <= tile_rows_cap else tile_rows_cap
    pad_r = (-rows) % tb
    if pad_r:
        yp = jnp.pad(yp, ((0, pad_r), (0, 0)))
    rows_padded = yp.shape[0]
    grid = (rows_padded // tb,)

    out_packed = pl.pallas_call(
        odefunc_kernel,
        out_shape=jax.ShapeDtypeStruct((rows_padded, pack * n), jnp.float32),
        grid=grid,
        in_specs=[
            pl.BlockSpec((tb, pack * n), lambda i: (i, 0)),            # lane-packed y tile
            pl.BlockSpec((2 * LANES + 8, pack * n), lambda i: (0, 0)),  # resident param slab
        ],
        out_specs=pl.BlockSpec((tb, pack * n), lambda i: (i, 0)),
        compiler_params=pltpu.CompilerParams(
            dimension_semantics=("parallel",)),     # shards tiles across TCs on v7x;
                                                    # plain serial loop on v5e/v6e
    )(yp, slab)

    # Undo the lane packing / padding (padding rows are at the end).
    return out_packed.reshape(-1, n)[:batch]


# ----------------------------- pure-JAX reference -----------------------------

def group_norm_ref(x, gamma, beta, num_groups, eps=EPS):
    b, c = x.shape
    xg = x.reshape(b, num_groups, c // num_groups)
    mean = xg.mean(axis=-1, keepdims=True)
    var = ((xg - mean) ** 2).mean(axis=-1, keepdims=True)
    xhat = ((xg - mean) / jnp.sqrt(var + eps)).reshape(b, c)
    return gamma * xhat + beta


def ref_forward(t, y, W1, b1, g1, bt1, W2, b2, g2, bt2):
    """Reproduces the exact PyTorch ODEFunc.forward semantics."""
    del t
    out = y @ W1.T + b1
    out = jnp.maximum(group_norm_ref(out, g1, bt1, num_groups=N), 0.0)
    out = out @ W2.T + b2
    out = jnp.maximum(group_norm_ref(out, g2, bt2, num_groups=N), 0.0)
    return out


if __name__ == "__main__":
    key = jax.random.PRNGKey(0)
    keys = jax.random.split(key, 9)

    # Deterministic synthetic parameters (shapes follow nn.Linear(N,N) / GroupNorm(N,N)).
    y = jax.random.normal(keys[0], (B, N), dtype=jnp.float32)
    W1 = jax.random.normal(keys[1], (N, N), dtype=jnp.float32) * 0.1
    b1 = jax.random.normal(keys[2], (N,), dtype=jnp.float32) * 0.1
    g1 = jax.random.normal(keys[3], (N,), dtype=jnp.float32) * 0.5 + 1.0
    bt1 = jax.random.normal(keys[4], (N,), dtype=jnp.float32) * 0.1
    W2 = jax.random.normal(keys[5], (N, N), dtype=jnp.float32) * 0.1
    b2 = jax.random.normal(keys[6], (N,), dtype=jnp.float32) * 0.1
    g2 = jax.random.normal(keys[7], (N,), dtype=jnp.float32) * 0.5 + 1.0
    bt2 = jax.random.normal(keys[8], (N,), dtype=jnp.float32) * 0.1

    slab = pack_params(W1, bt1, W2, bt2)

    t = jnp.float32(0.0)
    out = odefunc_forward(t, y, slab)
    out = jax.block_until_ready(out)

    ref = ref_forward(t, y, W1, b1, g1, bt1, W2, b2, g2, bt2)
    assert out.shape == (B, N)
    assert jnp.allclose(out, ref, atol=1e-5, rtol=1e-5), "mismatch vs reference"

    print("KERNEL_OK")
</pallas_src>

<mosaic_0001>
module attributes {stable_mosaic.version = 11 : i64} {
  func.func @odefunc_kernel(%arg0: i32, %arg1: memref<2x128xf32, #tpu.memory_space<vmem>>, %arg2: memref<264x128xf32, #tpu.memory_space<vmem>>, %arg3: memref<2x128xf32, #tpu.memory_space<vmem>>) attributes {dimension_semantics = [#tpu.dimension_semantics<parallel>], iteration_bounds = array<i64: 1>, scalar_prefetch = 0 : i64, scratch_operands = 0 : i64, tpu.core_type = #tpu.core_type<tc>, window_params = [{transform_indices = @transform_0, window_bounds = array<i64: 2, 128>}, {pipeline_mode = #tpu.pipeline_mode<synchronous>, transform_indices = @transform_1, window_bounds = array<i64: 264, 128>}, {transform_indices = @transform_2, window_bounds = array<i64: 2, 128>}]} {
    %c0 = arith.constant 0 : index
    %c0_0 = arith.constant 0 : index
    %0 = vector.load %arg1[%c0, %c0_0] : memref<2x128xf32, #tpu.memory_space<vmem>>, vector<2x128xf32>
    %c0_1 = arith.constant 0 : index
    %c0_2 = arith.constant 0 : index
    %1 = vector.load %arg2[%c0_1, %c0_2] : memref<264x128xf32, #tpu.memory_space<vmem>>, vector<128x128xf32>
    %c128 = arith.constant 128 : index
    %c0_3 = arith.constant 0 : index
    %2 = vector.load %arg2[%c128, %c0_3] : memref<264x128xf32, #tpu.memory_space<vmem>>, vector<128x128xf32>
    %c256 = arith.constant 256 : index
    %c0_4 = arith.constant 0 : index
    %3 = vector.load %arg2[%c256, %c0_4] : memref<264x128xf32, #tpu.memory_space<vmem>>, vector<1x128xf32>
    %c257 = arith.constant 257 : index
    %c0_5 = arith.constant 0 : index
    %4 = vector.load %arg2[%c257, %c0_5] : memref<264x128xf32, #tpu.memory_space<vmem>>, vector<1x128xf32>
    %cst = arith.constant dense<0.000000e+00> : vector<2x128xf32>
    %5 = tpu.matmul %0, %1, %cst {dimension_numbers = #tpu.dot_dimension_numbers<[1], [0], [0], [1], [0, 0, 1, 1], [], []>} : vector<2x128xf32>, vector<128x128xf32>, vector<2x128xf32> -> vector<2x128xf32>
    %cst_6 = arith.constant 0.000000e+00 : f32
    %6 = vector.broadcast %cst_6 : f32 to vector<2x128xf32>
    %7 = arith.mulf %5, %6 : vector<2x128xf32>
    %8 = vector.broadcast %3 : vector<1x128xf32> to vector<2x128xf32>
    %9 = arith.addf %7, %8 : vector<2x128xf32>
    %cst_7 = arith.constant 0.000000e+00 : f32
    %10 = vector.broadcast %cst_7 : f32 to vector<2x128xf32>
    %11 = arith.maximumf %9, %10 : vector<2x128xf32>
    %cst_8 = arith.constant dense<0.000000e+00> : vector<2x128xf32>
    %12 = tpu.matmul %11, %2, %cst_8 {dimension_numbers = #tpu.dot_dimension_numbers<[1], [0], [0], [1], [0, 0, 1, 1], [], []>} : vector<2x128xf32>, vector<128x128xf32>, vector<2x128xf32> -> vector<2x128xf32>
    %cst_9 = arith.constant 0.000000e+00 : f32
    %13 = vector.broadcast %cst_9 : f32 to vector<2x128xf32>
    %14 = arith.mulf %12, %13 : vector<2x128xf32>
    %15 = vector.broadcast %4 : vector<1x128xf32> to vector<2x128xf32>
    %16 = arith.addf %14, %15 : vector<2x128xf32>
    %cst_10 = arith.constant 0.000000e+00 : f32
    %17 = vector.broadcast %cst_10 : f32 to vector<2x128xf32>
    %18 = arith.maximumf %16, %17 : vector<2x128xf32>
    %c0_11 = arith.constant 0 : index
    %c0_12 = arith.constant 0 : index
    %19 = vector.load %arg3[%c0_11, %c0_12] : memref<2x128xf32, #tpu.memory_space<vmem>>, vector<2x128xf32>
    tpu.vector_store %arg3[%c0_11, %c0_12], %18 {strides = array<i32>} : memref<2x128xf32, #tpu.memory_space<vmem>>, vector<2x128xf32>,
    return
  }
  func.func @transform_0(%arg0: i32) -> (i32, i32) {
    %c0_i32 = arith.constant 0 : i32
    %c0_i32_0 = arith.constant 0 : i32
    return %arg0, %c0_i32 : i32, i32
  }
  func.func @transform_1(%arg0: i32) -> (i32, i32) {
    %c0_i32 = arith.constant 0 : i32
    %c0_i32_0 = arith.constant 0 : i32
    %c0_i32_1 = arith.constant 0 : i32
    return %c0_i32, %c0_i32_0 : i32, i32
  }
  func.func @transform_2(%arg0: i32) -> (i32, i32) {
    %c0_i32 = arith.constant 0 : i32
    %c0_i32_0 = arith.constant 0 : i32
    return %arg0, %c0_i32 : i32, i32
  }
}

</mosaic_0001>

<bundles_post_ra>
// kernel: tpu_custom_call.1
= control target key start
LH: loop header
LB: loop body
LE: loop exit
PB: predicated region body
PF: predicated region fallthrough
CT: control target
= control target key end

     0   :  { %7 = vsyncpa [#allocation3], 0  ;;  %s258_s0 = inlined_call_operand.hbm [shape: f32[2,128], index: 0, kind: input, shape index: {}]   ;;  %s259_s1 = inlined_call_operand.hbm [shape: f32[264,128], index: 1, kind: input, shape index: {}]   ;;  %s260_s2 = inlined_call_operand.hbm [shape: f32[2,128], index: 2, kind: output, shape index: {}]  }
   0x1   :  { %8 = vsyncpa [#allocation6], 0 }
   0x2   :  { %9 = vsyncpa [#allocation4], 0  ;;  %s15_s11 = sshll.u32 %s258_s0, 4  ;;  %s229_s12 = smov [#allocation2]   ;;  %s16_s11 = int_to_ptr.hbm [resolvable:$true] %s15_s11 }
   0x3   :  { %s17_s13 = sshll.u32 %s229_s12, 4  ;;  %s25_s16 = sshll.u32 %s259_s1, 4  ;;  %s18_s13 = int_to_ptr.vmem [resolvable:$true] %s17_s13  ;;  %s26_s16 = int_to_ptr.hbm [resolvable:$true] %s25_s16 }
   0x4   :  { %20 = dma.hbm_to_vmem [thread:$0]  %s16_s11, 32, %s18_s13, [#allocation3]  }
   0x5   :  { %s230_s17 = smov [#allocation5]   ;;  %s231_s19 = smov 128  }
   0x6   :  { %s27_s18 = sshll.u32 %s230_s17, 4  ;;  %s232_s20 = smov 8   ;;  %s28_s18 = int_to_ptr.vmem [resolvable:$true] %s27_s18 }
   0x7   :  { %33 = dma.hbm_to_vmem [thread:$0]  %s26_s16, 4224, %s28_s18, [#allocation6], %s231_s19, %s231_s19, %s232_s20  }
   0x8   :  { %223 = dma.done.wait [#allocation3], 32  }
   0x9   :  { %224 = vsyncadd [#allocation3], 4294967264 }
   0xa   :  { %225 = dma.done.wait [#allocation6], 4224  }
   0xb   :  { %226 = vsyncadd [#allocation6], 4294963072  ;;  %v58_v0 = vld [vmem:[#allocation5 + $0x78] sm:$0xff]  ;;  %v57_v1 = vld [vmem:[#allocation5 + $0x70] sm:$0xff]  ;;  %s233_s0 = smov [#allocation7]   ;;  %s133_s23 = sshll.u32 %s260_s2, 4  ;;  %s134_s23 = int_to_ptr.hbm [resolvable:$true] %s133_s23 }
   0xc   :  { %77 = vmatpush.msra.mxu0 %v58_v0  ;;  %v56_v2 = vld [vmem:[#allocation5 + $0x68] sm:$0xff]  ;;  %v55_v3 = vld [vmem:[#allocation5 + $0x60] sm:$0xff]  ;;  %v74_v4 = vld [vmem:[#allocation5 + $0xf8] sm:$0xff]  ;;  %s131_s1 = sshll.u32 %s233_s0, 4  ;;  %s132_s1 = int_to_ptr.vmem [resolvable:$true] %s131_s1 }
   0xd   :  { %v54_v5 = vld [vmem:[#allocation5 + $0x58] sm:$0xff]  ;;  %101 = vmatpush.msra.mxu1 %v74_v4  ;;  %v73_v6 = vld [vmem:[#allocation5 + $0xf0] sm:$0xff]  ;;  %v72_v7 = vld [vmem:[#allocation5 + $0xe8] sm:$0xff] }
   0xe   :  { %78 = vmatpush.msra.mxu0 %v57_v1  ;;  %v53_v8 = vld [vmem:[#allocation5 + $0x50] sm:$0xff]  ;;  %v71_v9 = vld [vmem:[#allocation5 + $0xe0] sm:$0xff]  ;;  %v52_v10 = vld [vmem:[#allocation5 + $0x48] sm:$0xff] }
   0xf   :  { %102 = vmatpush.msra.mxu1 %v73_v6  ;;  %v70_v11 = vld [vmem:[#allocation5 + $0xd8] sm:$0xff]  ;;  %v51_v12 = vld [vmem:[#allocation5 + $0x40] sm:$0xff]  ;;  %v69_v13 = vld [vmem:[#allocation5 + $0xd0] sm:$0xff] }
  0x10   :  { %79 = vmatpush.msra.mxu0 %v56_v2  ;;  %v50_v14 = vld [vmem:[#allocation5 + $0x38] sm:$0xff]  ;;  %v68_v15 = vld [vmem:[#allocation5 + $0xc8] sm:$0xff]  ;;  %v49_v16 = vld [vmem:[#allocation5 + $0x30] sm:$0xff] }
  0x11   :  { %103 = vmatpush.msra.mxu1 %v72_v7  ;;  %v67_v17 = vld [vmem:[#allocation5 + $0xc0] sm:$0xff]  ;;  %v48_v18 = vld [vmem:[#allocation5 + $0x28] sm:$0xff]  ;;  %v66_v19 = vld [vmem:[#allocation5 + $0xb8] sm:$0xff] }
  0x12   :  { %80 = vmatpush.msra.mxu0 %v55_v3  ;;  %v47_v20 = vld [vmem:[#allocation5 + $0x20] sm:$0xff]  ;;  %v65_v21 = vld [vmem:[#allocation5 + $0xb0] sm:$0xff]  ;;  %v46_v22 = vld [vmem:[#allocation5 + $0x18] sm:$0xff] }
  0x13   :  { %104 = vmatpush.msra.mxu1 %v71_v9  ;;  %v64_v23 = vld [vmem:[#allocation5 + $0xa8] sm:$0xff]  ;;  %v45_v24 = vld [vmem:[#allocation5 + $0x10] sm:$0xff]  ;;  %v63_v25 = vld [vmem:[#allocation5 + $0xa0] sm:$0xff] }
  0x14   :  { %81 = vmatpush.msra.mxu0 %v54_v5  ;;  %v44_v26 = vld [vmem:[#allocation5 + $0x8] sm:$0xff]  ;;  %v43_v27 = vld [vmem:[#allocation5] sm:$0xff]  ;;  %v42_v28 = vld [vmem:[#allocation2] sm:$0x3] }
  0x15   :  { %105 = vmatpush.msra.mxu1 %v70_v11  ;;  %v62_v29 = vld [vmem:[#allocation5 + $0x98] sm:$0xff]  ;;  %v61_v30 = vld [vmem:[#allocation5 + $0x90] sm:$0xff]  ;;  %v60_v31 = vld [vmem:[#allocation5 + $0x88] sm:$0xff] }
  0x16   :  { %82 = vmatpush.msra.mxu0 %v53_v8  ;;  %v59_v32 = vld [vmem:[#allocation5 + $0x80] sm:$0xff] }
  0x17   :  { %106 = vmatpush.msra.mxu1 %v69_v13  ;;  %v149_v33 = vld [vmem:[#allocation5 + $0x100] ss:$0 sm:$0xff]  ;;  %v150_v38 = vld [vmem:[#allocation5 + $0x101] ss:$0 sm:$0xff] }
  0x18   :  { %83 = vmatpush.msra.mxu0 %v52_v10 }
  0x19   :  { %107 = vmatpush.msra.mxu1 %v68_v15 }
  0x1a   :  { %84 = vmatpush.msra.mxu0 %v51_v12 }
  0x1b   :  { %108 = vmatpush.msra.mxu1 %v67_v17 }
  0x1c   :  { %85 = vmatpush.msra.mxu0 %v50_v14 }
  0x1d   :  { %109 = vmatpush.msra.mxu1 %v66_v19 }
  0x1e   :  { %86 = vmatpush.msra.mxu0 %v49_v16 }
  0x1f   :  { %110 = vmatpush.msra.mxu1 %v65_v21 }
  0x20   :  { %87 = vmatpush.msra.mxu0 %v48_v18 }
  0x21   :  { %111 = vmatpush.msra.mxu1 %v64_v23 }
  0x22   :  { %88 = vmatpush.msra.mxu0 %v47_v20 }
  0x23   :  { %112 = vmatpush.msra.mxu1 %v63_v25 }
  0x24   :  { %89 = vmatpush.msra.mxu0 %v46_v22 }
  0x25   :  { %113 = vmatpush.msra.mxu1 %v62_v29 }
  0x26   :  { %90 = vmatpush.msra.mxu0 %v45_v24 }
  0x27   :  { %114 = vmatpush.msra.mxu1 %v61_v30 }
  0x28   :  { %91 = vmatpush.msra.mxu0 %v44_v26 }
  0x29   :  { %115 = vmatpush.msra.mxu1 %v60_v31 }
  0x2a   :  { %92 = vmatpush.msra.mxu0 %v43_v27 }
  0x2b   :  { %93 = vmatmul.f32.vlgmr.msra.gmra.mxu0 %v42_v28  ;;  %116 = vmatpush.msra.mxu1 %v59_v32 }
  0xa8   :  { %v94_v34 = vpop.f32.mrf.mxu0 }
  0xa9   :  { %v97_v35 = vmul.f32 0.0, %v94_v34 }
  0xab   :  { %v99_v36 = vadd.f32 %v149_v33, %v97_v35 }
  0xad   :  { %v100_v37 = vmax.f32 %v99_v36, 0.0 }
  0xaf   :  { %117 = vmatmul.f32.vlgmr.msra.gmra.mxu1 %v100_v37 }
 0x12c   :  { %v118_v39 = vpop.f32.mrf.mxu1 }
 0x12d   :  { %v121_v40 = vmul.f32 0.0, %v118_v39 }
 0x12f   :  { %v123_v41 = vadd.f32 %v150_v38, %v121_v40 }
 0x131   :  { %v124_v42 = vmax.f32 %v123_v41, 0.0 }
 0x133   :  { %125 = vst [vmem:[#allocation7] sm:$0x3] %v124_v42 }
 0x134   :  { %136 = dma.vmem_to_hbm [thread:$0]  %s132_s1, 32, %s134_s23, [#allocation4]  }
 0x135   :  { %227 = dma.done.wait [#allocation4], 32  }
 0x136   :  { %228 = vsyncadd [#allocation4], 4294967264 }
 0x137   :  { %141 = vsyncpa [#allocation3], 1 }
 0x138   :  { %142 = vsyncpa [#allocation6], 1 }
 0x139   :  { %143 = vsyncpa [#allocation4], 1 }

</bundles_post_ra>
